<compile_context>
chip_gen: v6e
topology: v6e:2x2x1
jax: 0.10.0
libtpu: 0.0.40
codegen_flags: <defaults>
</compile_context>

<pallas_src>
import functools
import math

import jax
import jax.numpy as jnp
from jax.experimental import pallas as pl
from jax.experimental.pallas import tpu as pltpu

LANE = 128
_RESIDENT_B_BYTES = 24 * 1024 * 1024   # budget for a fully VMEM-resident B


def _round_up(a: int, b: int) -> int:
    return -(-a // b) * b


def _choose_tiling(n: int):
    """Return (nm, tm, nk, tk): padded row/col extents and adj tile sizes."""
    if n <= 1024:
        # Single k step (full adj row width, padded to a lane multiple).
        tk = _round_up(max(n, 1), LANE)
        nk = tk
        if n > 8:
            # >=2 row tiles so the "parallel" axis can feed both v7x cores.
            tm = _round_up(-(-n // 2), 8)
            nm = 2 * tm
        else:
            tm = 8
            nm = 8
        return nm, tm, nk, tk
    # Large graphs: big tiles amortize per-step overhead and the f32
    # accumulator read-modify-write.
    tm = 512
    if n > 4096:
        tk = 2048
    elif n > 2048:
        tk = 1024
    else:
        tk = 512
    return _round_up(n, tm), tm, _round_up(n, tk), tk


def _pad2(a, rows: int, cols: int):
    if a.shape == (rows, cols):
        return a
    return jnp.pad(a, ((0, rows - a.shape[0]), (0, cols - a.shape[1])))


def _vmem_limit_bytes() -> int:
    # ~75% of per-core VMEM, capped at 100 MiB: ~48 MiB on v7x (64 MiB/TC),
    # ~96-100 MiB on v5e / v6e (128 MiB physical).
    try:
        cap = int(pltpu.get_tpu_info().vmem_capacity_bytes)
    except Exception:
        cap = 64 * 1024 * 1024
    return min((cap * 3) // 4, 100 * 1024 * 1024)


def _adj_block_spec(tm: int, tk: int, k_steps: int):
    index_map = lambda i, k: (i, k)
    if k_steps >= 3:
        # DMA-bound regime: a 3-deep adj pipeline hides per-step DMA jitter and
        # step-boundary bubbles.  Fall back gracefully if unsupported.
        try:
            return pl.BlockSpec((tm, tk), index_map,
                                pipeline_mode=pl.Buffered(3))
        except (TypeError, AttributeError):
            pass
    return pl.BlockSpec((tm, tk), index_map)


def _make_kernel(project_last: bool, b_resident: bool, tk: int, compute_dtype):
    """out_row_tile = adj_row_tile @ B  (+ optional final projection by W)."""

    def body(adj_ref, b_ref, w_ref, out_ref, acc_ref):
        k = pl.program_id(1)

        a = adj_ref[...].astype(compute_dtype)       # per-tile cast (VPU slack)
        if b_resident:
            off = pl.multiple_of(k * tk, tk)
            b = b_ref[pl.ds(off, tk), :]              # B DMA'd to VMEM only once
        else:
            b = b_ref[...]
        prod = jnp.dot(a, b, preferred_element_type=jnp.float32)

        @pl.when(k == 0)
        def _():                      # direct store: no zero-init + reload pass
            acc_ref[...] = prod

        @pl.when(k > 0)
        def _():
            acc_ref[...] += prod

        @pl.when(k == pl.num_programs(1) - 1)
        def _():
            if project_last:
                # f32 accumulator x f32 W: no double rounding through bf16.
                out_ref[...] = jnp.dot(
                    acc_ref[...], w_ref[...],
                    preferred_element_type=jnp.float32).astype(out_ref.dtype)
            else:
                out_ref[...] = acc_ref[...].astype(out_ref.dtype)

    if project_last:
        def kernel(adj_ref, b_ref, w_ref, out_ref, acc_ref):
            body(adj_ref, b_ref, w_ref, out_ref, acc_ref)
    else:
        def kernel(adj_ref, b_ref, out_ref, acc_ref):
            body(adj_ref, b_ref, None, out_ref, acc_ref)
    return kernel


@functools.partial(jax.jit, static_argnames=("compute_dtype",))
def graph_convolution(x, adj, weight, *, compute_dtype=jnp.bfloat16):
    """Pallas GraphConvolution.forward: adj @ (x @ weight).  No bias (spec)."""
    n, f_in = x.shape
    f_out = weight.shape[1]
    assert adj.shape == (n, n)
    assert weight.shape == (f_in, f_out)
    out_dtype = x.dtype

    fi_p = _round_up(f_in, LANE)
    fo_p = _round_up(f_out, LANE)
    nm, tm, nk, tk = _choose_tiling(n)
    row_tiles = nm // tm
    k_steps = nk // tk

    # Reassociate so the N^2-scale matmul runs over min(F_in, F_out) columns.
    project_last = fi_p < fo_p            # (adj @ x) @ W inside the kernel
    b_cols = fi_p if project_last else fo_p

    # adj streams in its native dtype (no extra full-HBM pre-cast pass); pad
    # only when the shape requires it.
    adj_p = _pad2(adj, nm, nk)

    itemsize_b = jnp.dtype(compute_dtype).itemsize
    b_resident = (k_steps > 1) and (nk * b_cols * itemsize_b <= _RESIDENT_B_BYTES)

    in_specs = [_adj_block_spec(tm, tk, k_steps)]
    operands = [adj_p]

    if project_last:
        b_mat = _pad2(x.astype(compute_dtype), nk, fi_p)
    else:
        # support = x @ W computed exactly once (tiny vs. adj @ support).
        support = jnp.dot(x.astype(jnp.float32), weight.astype(jnp.float32))
        b_mat = _pad2(support.astype(compute_dtype), nk, fo_p)

    if b_resident:
        in_specs.append(pl.BlockSpec((nk, b_cols), lambda i, k: (0, 0)))
    else:
        in_specs.append(pl.BlockSpec((tk, b_cols), lambda i, k: (k, 0)))
    operands.append(b_mat)

    if project_last:
        w_f32 = _pad2(weight.astype(jnp.float32), fi_p, fo_p)
        in_specs.append(pl.BlockSpec((fi_p, fo_p), lambda i, k: (0, 0)))
        operands.append(w_f32)

    kernel = _make_kernel(project_last, b_resident, tk, compute_dtype)

    # Honest cost metadata for this schedule (actual DMA bytes / MXU FLOPs).
    flops = 2 * nm * nk * b_cols
    bytes_accessed = (nm * nk * jnp.dtype(adj_p.dtype).itemsize
                      + (1 if b_resident else row_tiles) * nk * b_cols * itemsize_b
                      + nm * fo_p * jnp.dtype(out_dtype).itemsize)
    if project_last:
        flops += 2 * nm * fi_p * fo_p
        bytes_accessed += fi_p * fo_p * 4

    out_p = pl.pallas_call(
        kernel,
        out_shape=jax.ShapeDtypeStruct((nm, fo_p), out_dtype),
        grid_spec=pltpu.PrefetchScalarGridSpec(
            num_scalar_prefetch=0,
            grid=(row_tiles, k_steps),
            in_specs=in_specs,
            out_specs=pl.BlockSpec((tm, fo_p), lambda i, k: (i, 0)),
            scratch_shapes=[pltpu.VMEM((tm, b_cols), jnp.float32)],
        ),
        compiler_params=pltpu.CompilerParams(
            dimension_semantics=("parallel", "arbitrary"),
            vmem_limit_bytes=_vmem_limit_bytes(),
        ),
        cost_estimate=pl.CostEstimate(
            flops=flops, transcendentals=0, bytes_accessed=bytes_accessed),
    )(*operands)

    return out_p[:n, :f_out]


def xavier_uniform(key, shape, gain):
    fan_in, fan_out = shape
    bound = gain * math.sqrt(6.0 / (fan_in + fan_out))
    return jax.random.uniform(key, shape, jnp.float32, minval=-bound, maxval=bound)


def _max_rel_err(out, ref):
    return float(jnp.max(jnp.abs(out - ref))) / (float(jnp.max(jnp.abs(ref))) + 1e-6)


if __name__ == "__main__":
    key = jax.random.PRNGKey(0)
    keys = jax.random.split(key, 8)

    # ---- Small shapes consistent with the module: N nodes, input_dim, output_dim.
    N, F_IN, F_OUT = 16, 8, 32
    weight = xavier_uniform(keys[0], (F_IN, F_OUT), gain=math.sqrt(2.0))
    x = jax.random.normal(keys[1], (N, F_IN), dtype=jnp.float32)
    a_raw = jax.random.uniform(keys[2], (N, N), dtype=jnp.float32)
    adj = 0.5 * (a_raw + a_raw.T)            # symmetric "adjacency-like" matrix

    ref = adj @ (x @ weight)                 # plain-JAX reference (module semantics)

    out_f32 = jax.block_until_ready(
        graph_convolution(x, adj, weight, compute_dtype=jnp.float32))
    assert out_f32.shape == (N, F_OUT)
    assert jnp.allclose(out_f32, ref, atol=5e-2, rtol=5e-2), (
        float(jnp.max(jnp.abs(out_f32 - ref))))

    out_bf16 = jax.block_until_ready(graph_convolution(x, adj, weight))
    assert out_bf16.shape == (N, F_OUT)
    assert jnp.allclose(out_bf16, ref, atol=1e-1, rtol=1e-1), (
        float(jnp.max(jnp.abs(out_bf16 - ref))))

    # ---- F_out < F_in: support precomputed once, streamed at F_out width.
    w2 = xavier_uniform(keys[3], (F_OUT, F_IN), gain=math.sqrt(2.0))
    x2 = jax.random.normal(keys[4], (N, F_OUT), dtype=jnp.float32)
    ref2 = adj @ (x2 @ w2)
    out2 = jax.block_until_ready(
        graph_convolution(x2, adj, w2, compute_dtype=jnp.float32))
    assert out2.shape == (N, F_IN)
    assert jnp.allclose(out2, ref2, atol=5e-2, rtol=5e-2), (
        float(jnp.max(jnp.abs(out2 - ref2))))

    # ---- F_in < F_out (padded): (adj @ x) @ W path, f32-accumulator finalize.
    F_OUT3 = 200
    w3 = xavier_uniform(keys[5], (F_IN, F_OUT3), gain=math.sqrt(2.0))
    ref3 = adj @ (x @ w3)
    out3_f32 = jax.block_until_ready(
        graph_convolution(x, adj, w3, compute_dtype=jnp.float32))
    assert out3_f32.shape == (N, F_OUT3)
    assert jnp.allclose(out3_f32, ref3, atol=5e-2, rtol=5e-2), (
        float(jnp.max(jnp.abs(out3_f32 - ref3))))
    out3_bf16 = jax.block_until_ready(graph_convolution(x, adj, w3))
    assert jnp.allclose(out3_bf16, ref3, atol=1e-1, rtol=1e-1), (
        float(jnp.max(jnp.abs(out3_bf16 - ref3))))

    # ---- Medium graph: exercises the streamed-adj multi-k path, the fully
    # VMEM-resident support, the 3-deep adj pipeline and >=2 parallel row tiles.
    N4, F_IN4, F_OUT4 = 1536, 64, 32
    w4 = xavier_uniform(keys[6], (F_IN4, F_OUT4), gain=math.sqrt(2.0))
    x4 = jax.random.normal(keys[7], (N4, F_IN4), dtype=jnp.float32)
    a4 = jax.random.uniform(jax.random.PRNGKey(1), (N4, N4), dtype=jnp.float32)
    adj4 = 0.5 * (a4 + a4.T)
    ref4 = adj4 @ (x4 @ w4)

    out4_f32 = jax.block_until_ready(
        graph_convolution(x4, adj4, w4, compute_dtype=jnp.float32))
    assert out4_f32.shape == (N4, F_OUT4)
    assert _max_rel_err(out4_f32, ref4) < 5e-2, _max_rel_err(out4_f32, ref4)

    out4_bf16 = jax.block_until_ready(graph_convolution(x4, adj4, w4))
    assert out4_bf16.shape == (N4, F_OUT4)
    assert _max_rel_err(out4_bf16, ref4) < 5e-2, _max_rel_err(out4_bf16, ref4)

    print("KERNEL_OK")
</pallas_src>

<mosaic_0001>
module attributes {stable_mosaic.version = 11 : i64} {
  func.func @kernel(%arg0: i32, %arg1: i32, %arg2: memref<8x128xf32, #tpu.memory_space<vmem>>, %arg3: memref<128x128xf32, #tpu.memory_space<vmem>>, %arg4: memref<8x128xf32, #tpu.memory_space<vmem>>, %arg5: memref<8x128xf32, #tpu.memory_space<vmem>>) attributes {dimension_semantics = [#tpu.dimension_semantics<parallel>, #tpu.dimension_semantics<arbitrary>], iteration_bounds = array<i64: 2, 1>, scalar_prefetch = 0 : i64, scratch_operands = 1 : i64, tpu.core_type = #tpu.core_type<tc>, window_params = [{transform_indices = @transform_0, window_bounds = array<i64: 8, 128>}, {transform_indices = @transform_1, window_bounds = array<i64: 128, 128>}, {transform_indices = @transform_2, window_bounds = array<i64: 8, 128>}]} {
    %c0 = arith.constant 0 : index
    %c0_0 = arith.constant 0 : index
    %0 = vector.load %arg2[%c0, %c0_0] : memref<8x128xf32, #tpu.memory_space<vmem>>, vector<8x128xf32>
    %c0_1 = arith.constant 0 : index
    %c0_2 = arith.constant 0 : index
    %1 = vector.load %arg3[%c0_1, %c0_2] : memref<128x128xf32, #tpu.memory_space<vmem>>, vector<128x128xf32>
    %cst = arith.constant dense<0.000000e+00> : vector<8x128xf32>
    %2 = tpu.matmul %0, %1, %cst {dimension_numbers = #tpu.dot_dimension_numbers<[1], [0], [0], [1], [0, 0, 1, 1], [], []>} : vector<8x128xf32>, vector<128x128xf32>, vector<8x128xf32> -> vector<8x128xf32>
    %c0_i32 = arith.constant 0 : i32
    %3 = arith.cmpi eq, %arg1, %c0_i32 : i32
    %4 = arith.extui %3 : i1 to i32
    %c0_i32_3 = arith.constant 0 : i32
    %5 = arith.cmpi ne, %4, %c0_i32_3 : i32
    scf.if %5 {
      %c0_8 = arith.constant 0 : index
      %c0_9 = arith.constant 0 : index
      %12 = vector.load %arg5[%c0_8, %c0_9] : memref<8x128xf32, #tpu.memory_space<vmem>>, vector<8x128xf32>
      tpu.vector_store %arg5[%c0_8, %c0_9], %2 {strides = array<i32>} : memref<8x128xf32, #tpu.memory_space<vmem>>, vector<8x128xf32>,
    } else {
    }
    %c0_i32_4 = arith.constant 0 : i32
    %6 = arith.cmpi sgt, %arg1, %c0_i32_4 : i32
    %7 = arith.extui %6 : i1 to i32
    %c0_i32_5 = arith.constant 0 : i32
    %8 = arith.cmpi ne, %7, %c0_i32_5 : i32
    scf.if %8 {
      %c0_8 = arith.constant 0 : index
      %c0_9 = arith.constant 0 : index
      %12 = vector.load %arg5[%c0_8, %c0_9] : memref<8x128xf32, #tpu.memory_space<vmem>>, vector<8x128xf32>
      %13 = arith.addf %12, %2 : vector<8x128xf32>
      %c0_10 = arith.constant 0 : index
      %c0_11 = arith.constant 0 : index
      %14 = vector.load %arg5[%c0_10, %c0_11] : memref<8x128xf32, #tpu.memory_space<vmem>>, vector<8x128xf32>
      tpu.vector_store %arg5[%c0_10, %c0_11], %13 {strides = array<i32>} : memref<8x128xf32, #tpu.memory_space<vmem>>, vector<8x128xf32>,
    } else {
    }
    %c0_i32_6 = arith.constant 0 : i32
    %9 = arith.cmpi eq, %arg1, %c0_i32_6 : i32
    %10 = arith.extui %9 : i1 to i32
    %c0_i32_7 = arith.constant 0 : i32
    %11 = arith.cmpi ne, %10, %c0_i32_7 : i32
    scf.if %11 {
      %c0_8 = arith.constant 0 : index
      %c0_9 = arith.constant 0 : index
      %12 = vector.load %arg5[%c0_8, %c0_9] : memref<8x128xf32, #tpu.memory_space<vmem>>, vector<8x128xf32>
      %c0_10 = arith.constant 0 : index
      %c0_11 = arith.constant 0 : index
      %13 = vector.load %arg4[%c0_10, %c0_11] : memref<8x128xf32, #tpu.memory_space<vmem>>, vector<8x128xf32>
      tpu.vector_store %arg4[%c0_10, %c0_11], %12 {strides = array<i32>} : memref<8x128xf32, #tpu.memory_space<vmem>>, vector<8x128xf32>,
    } else {
    }
    return
  }
  func.func @transform_0(%arg0: i32, %arg1: i32) -> (i32, i32) {
    %c0_i32 = arith.constant 0 : i32
    return %arg0, %arg1 : i32, i32
  }
  func.func @transform_1(%arg0: i32, %arg1: i32) -> (i32, i32) {
    %c0_i32 = arith.constant 0 : i32
    %c0_i32_0 = arith.constant 0 : i32
    return %arg1, %c0_i32 : i32, i32
  }
  func.func @transform_2(%arg0: i32, %arg1: i32) -> (i32, i32) {
    %c0_i32 = arith.constant 0 : i32
    %c0_i32_0 = arith.constant 0 : i32
    return %arg0, %c0_i32 : i32, i32
  }
}

</mosaic_0001>

<bundles_post_ra>
// kernel: graph_convolution.1
= control target key start
LH: loop header
LB: loop body
LE: loop exit
PB: predicated region body
PF: predicated region fallthrough
CT: control target
= control target key end

     0   :  { %7 = vsyncpa [#allocation4], 0  ;;  %s763_s0 = inlined_call_operand.vmem [shape: f32[16,128], index: 0, kind: input, shape index: {}]   ;;  %s764_s1 = inlined_call_operand.vmem [shape: f32[128,128], index: 1, kind: input, shape index: {}]   ;;  %s765_s2 = inlined_call_operand.hbm [shape: f32[16,128], index: 2, kind: output, shape index: {}]  }
   0x1   :  { %9 = vsyncpa [#allocation4 + $0x1], 0  ;;  %s604_s9 = smov 0   ;;  %s606_s10 = smov 0  }
   0x2   :  { %s608_s11 = smov 0   ;;  %s610_s12 = smov 0  }
   0x3   :  { %s612_s13 = smov 0   ;;  %s614_s14 = smov 0  }
   0x4 LB: > { %s387_s15 = sadd.s32 4294967295, %s584_s14   ;;  %s388_s16 = sadd.s32 4294967294, %s584_s14   ;;  %s584_s14 = sphi %s614_s14, %s15_s14   ;;  %s580_s13 = sphi %s612_s13, %s772_s13   ;;  %s576_s12 = sphi %s610_s12, %s771_s12   ;;  %s572_s11 = sphi %s608_s11, %s770_s11   ;;  %s568_s10 = sphi %s606_s10, %s769_s10   ;;  %s564_s9 = sphi %s604_s9, %s768_s9  }
   0x5   : > { %s27_s17 = sadd.s32 1, %s580_s13  ;;  %s88_s18 = sadd.s32 1, %s572_s11 }
   0x6   : > { %p29_p0 = scmp.ge.s32.totalorder %s27_s17, 2  ;;  %p98_p1 = scmp.ne.s32.totalorder %s572_s11, %s568_s10 }
   0x7   : > { %p99_p2 = scmp.eq.s32.totalorder %s387_s15, 1  ;;  %p104_p3 = scmp.ne.s32.totalorder %s568_s10, %s564_s9 }
   0x8   : > { %s774_s17 = smov (%p29_p0, %s27_s17), 0  ;;  %p105_p5 = scmp.eq.s32.totalorder %s388_s16, 1 }
   0x9   : > { %p644_p4 = por %p99_p2, %p98_p1  ;;  %s85_s20 = ssub.s32 %s580_s13, %s774_s17 }
   0xa   : > { %p392_p6 = scmp.ge.s32.totalorder %s584_s14, 1  ;;  %p86_p7 = scmp.eq.s32.totalorder %s85_s20, 0 }
   0xb   : > { %p651_p8 = por %p105_p5, %p104_p3  ;;  %p142_p9 = scmp.lt.s32.totalorder %s584_s14, 3 }
   0xc   : > { %s657_s22 = scalar_select %p86_p7, %s572_s11, %s88_s18  }
   0xd   : > { %p143_p10 = pnand %p392_p6, %p142_p9 }
   0xe   : > { %p171_p11 = scmp.lt.s32.totalorder (!%p143_p10), %s576_s12, 1  ;;  %s168_s24 = sand.u32 (!%p143_p10), 1, %s568_s10  }
   0xf   : > { %146 = sbr.rel (%p143_p10) target bundleno = 260 (0x104), region = 28  ;;  %s393_s25 = sshll.u32 (!%p143_p10), %s168_s24, 3 }
  0x10   : > { %s170_s26 = scalar_lea.vmem (!%p143_p10), [#allocation3], %s393_s25  ;;  %s396_s28 = sshll.u32 (!%p143_p10), %s576_s12, 7 }
  0x11   : > { %s719_s3 = scalar_lea.hbm (!%p143_p10), %s765_s2, %s396_s28 }
  0x14   : > { %v200_v0 = vld [vmem:[%s764_s1 + $0x78] sm:$0xff]  ;;  %v586_v1 = vmov 0.0   ;;  %v199_v2 = vld [vmem:[%s764_s1 + $0x70] sm:$0xff]  ;;  %vm587_vm0 = vmmov 0   ;;  %v198_v3 = vld [vmem:[%s764_s1 + $0x68] sm:$0xff]  ;;  %s172_s27 = scalar_select %p171_p11, %s576_s12, 1 }
  0x15   : > { %416 = vmatprep.subr.mxu0 %v586_v1  ;;  %448 = vmatprep.mubr.msk.f32.mxu0 %vm587_vm0, %v586_v1  ;;  %v197_v4 = vld [vmem:[%s764_s1 + $0x60] sm:$0xff]  ;;  %v196_v5 = vld [vmem:[%s764_s1 + $0x58] sm:$0xff]  ;;  %v195_v6 = vld [vmem:[%s764_s1 + $0x50] sm:$0xff]  ;;  %s588_s12 = smov [#allocation3]  }
  0x16   : > { %417 = vmatpush3.msra.mxu0 %v200_v0  ;;  %v194_v7 = vld [vmem:[%s764_s1 + $0x48] sm:$0xff]  ;;  %v193_v8 = vld [vmem:[%s764_s1 + $0x40] sm:$0xff]  ;;  %v192_v9 = vld [vmem:[%s764_s1 + $0x38] sm:$0xff]  ;;  %s394_s4 = sshll.u32 %s172_s27, 3  ;;  %s302_s27 = sshll.u32 %s170_s26, 4  ;;  %s714_s27 = int_to_ptr.vmem [resolvable:$true] %s302_s27 }
  0x17   : > { %418 = vmatprep.subr.mxu0 %v586_v1  ;;  %v191_v10 = vld [vmem:[%s764_s1 + $0x30] sm:$0xff]  ;;  %v190_v11 = vld [vmem:[%s764_s1 + $0x28] sm:$0xff]  ;;  %v189_v12 = vld [vmem:[%s764_s1 + $0x20] sm:$0xff]  ;;  %s177_s18 = scalar_lea.vmem %s763_s0, %s394_s4  ;;  %s289_s4 = scalar_lea.sflag [#allocation4], %s168_s24 }
  0x18   : > { %419 = vmatpush3.msra.mxu0 %v199_v2  ;;  %v188_v13 = vld [vmem:[%s764_s1 + $0x18] sm:$0xff]  ;;  %v187_v14 = vld [vmem:[%s764_s1 + $0x10] sm:$0xff]  ;;  %v186_v15 = vld [vmem:[%s764_s1 + $0x8] sm:$0xff]  ;;  %s508_s5 = scalar_lea.vmem %s714_s27, 128  ;;  %s512_s6 = sshll.u32 %s588_s12, 4  ;;  %s513_s6 = int_to_ptr.vmem [resolvable:$false] %s512_s6 }
  0x19   : > { %420 = vmatprep.subr.mxu0 %v586_v1  ;;  %v185_v16 = vld [vmem:[%s764_s1] sm:$0xff]  ;;  %p509_p12 = scmp.ne.s32.totalorder %s714_s27, %s508_s5  ;;  %s514_s7 = scalar_lea.vmem %s513_s6, 256 }
  0x1a   : > { %421 = vmatpush3.msra.mxu0 %v198_v3  ;;  %v184_v17 = vld [vmem:[%s177_s18] sm:$0xff]  ;;  %p515_p1 = scmp.lt.s32.totalorder %s714_s27, %s513_s6  ;;  %p516_p2 = scmp.lt.s32.totalorder %s514_s7, %s508_s5 }
  0x1b   : > { %422 = vmatprep.subr.mxu0 %v586_v1  ;;  %p510_p13 = pnand %p509_p12, %p644_p4 }
  0x1c   : > { %423 = vmatpush3.msra.mxu0 %v197_v4  ;;  %p517_p3 = por %p516_p2, %p515_p1 }
  0x1d   : > { %424 = vmatprep.subr.mxu0 %v586_v1  ;;  %p511_p0 = pneg %p510_p13 }
  0x1e   : > { %425 = vmatpush3.msra.mxu0 %v196_v5 }
  0x1f   : > { %426 = vmatprep.subr.mxu0 %v586_v1  ;;  %p518_p5 = pnand %p517_p3, %p511_p0 }
  0x20   : > { %427 = vmatpush3.msra.mxu0 %v195_v6 }
  0x21   : > { %428 = vmatprep.subr.mxu0 %v586_v1 }
  0x22   : > { %429 = vmatpush3.msra.mxu0 %v194_v7 }
  0x23   : > { %430 = vmatprep.subr.mxu0 %v586_v1 }
  0x24   : > { %431 = vmatpush3.msra.mxu0 %v193_v8 }
  0x25   : > { %432 = vmatprep.subr.mxu0 %v586_v1 }
  0x26   : > { %433 = vmatpush3.msra.mxu0 %v192_v9 }
  0x27   : > { %434 = vmatprep.subr.mxu0 %v586_v1 }
  0x28   : > { %435 = vmatpush3.msra.mxu0 %v191_v10 }
  0x29   : > { %436 = vmatprep.subr.mxu0 %v586_v1 }
  0x2a   : > { %437 = vmatpush3.msra.mxu0 %v190_v11 }
  0x2b   : > { %438 = vmatprep.subr.mxu0 %v586_v1 }
  0x2c   : > { %439 = vmatpush3.msra.mxu0 %v189_v12 }
  0x2d   : > { %440 = vmatprep.subr.mxu0 %v586_v1 }
  0x2e   : > { %441 = vmatpush3.msra.mxu0 %v188_v13 }
  0x2f   : > { %442 = vmatprep.subr.mxu0 %v586_v1 }
  0x30   : > { %443 = vmatpush3.msra.mxu0 %v187_v14 }
  0x31   : > { %444 = vmatprep.subr.mxu0 %v586_v1 }
  0x32   : > { %445 = vmatpush3.msra.mxu0 %v186_v15 }
  0x33   : > { %446 = vmatprep.subr.mxu0 %v586_v1 }
  0x34   : > { %447 = vmatpush3.msra.mxu0 %v185_v16 }
  0x35   : > { %449 = vmatmul.mubr.f32.vlgmr.msra.gmra.mxu0 %v184_v17 }
  0xf5   : > { %v267_v18 = vpop.f32.mrf.mxu0 }
  0xf6   : > { %287 = vst [vmem:[%s170_s26] sm:$0xff] %v267_v18 }
  0xf7   : > { %v450_v19 = vpop.f32.mrf.mxu0 }
  0xf8   : > { %521 = shalt.err (!%p518_p5)
}
  0xf9   : > { %s522_s8 = scalar_lea.hbm %s719_s3, 128  ;;  %s526_s18 = scalar_lea.hbm %s765_s2, 256 }
  0xfa   : > { %p523_p6 = scmp.ne.s32.totalorder %s719_s3, %s522_s8  ;;  %p527_p10 = scmp.lt.s32.totalorder %s719_s3, %s765_s2 }
  0xfb   : > { %p528_p11 = scmp.lt.s32.totalorder %s526_s18, %s522_s8 }
  0xfc   : > { %p524_p7 = pnand %p523_p6, %p644_p4 }
  0xfd   : > { %p529_p12 = por %p528_p11, %p527_p10 }
  0xfe   : > { %p525_p9 = pneg %p524_p7 }
 0x100   : > { %p530_p13 = pnand %p529_p12, %p525_p9 }
 0x102   : > { %533 = shalt.err (!%p530_p13)
}
 0x103   : > { %451 = dma.vmem_to_hbm [thread:$0]  (%p644_p4), %s714_s27, 128, %s719_s3, %s289_s4  }
 0x104 PF: > { %p457_p0 = scmp.ge.s32.totalorder %s584_s14, 2  ;;  %s314_s24 = sand.u32 1, %s564_s9  }
 0x105   : > { %s315_s25 = scalar_lea.sflag [#allocation4], %s314_s24 }
 0x106   : > { %p454_p1 = pnand %p457_p0, %p651_p8 }
 0x108   : > { %p455_p2 = pneg %p454_p1 }
 0x10a   : > { %559 = dma.done.wait (%p455_p2), %s315_s25, 128  }
 0x10b   : > { %561 = vsyncadd (%p455_p2), %s315_s25, 4294967168  ;;  %s15_s14 = sadd.s32 1, %s584_s14   ;;  %s768_s9 = smov %s568_s10 }
 0x10c   : > { %p12_p3 = scmp.ge.s32.totalorder %s15_s14, 4   ;;  %s769_s10 = smov %s572_s11 }
 0x10d   : > { %s770_s11 = smov %s657_s22  ;;  %s771_s12 = smov %s580_s13 }
 0x10e   : > { %s772_s13 = smov %s774_s17  ;;  %14 = sbr.rel (!%p12_p3) target bundleno = 4 (0x4), region = 78 }
 0x113   :  { %320 = vsyncpa [#allocation4], 1 }
 0x114   :  { %322 = vsyncpa [#allocation4 + $0x1], 1 }

</bundles_post_ra>
